<compile_context>
chip_gen: v6e
topology: v6e:2x2x1
jax: 0.10.0
libtpu: 0.0.40
codegen_flags: <defaults>
</compile_context>

<pallas_src>
import jax
import jax.numpy as jnp
from jax.experimental import pallas as pl
from jax.experimental.pallas import tpu as pltpu  # noqa: F401  (TPU backend)


# ---------------------------------------------------------------------------
# Fused multi-timestep kernel: ONE pallas_call, ONE batched matmul for all T
# timesteps, unrolled elementwise recurrence, single writeback.
# ---------------------------------------------------------------------------
def readout_integrator_sequence(input_spikes, weight, bias, tau_m, mem0):
    """Run T readout-integrator steps in a single fused Pallas kernel.

    Args:
      input_spikes: [T, B, input_dim]
      weight:       [output_dim, input_dim]  (PyTorch nn.Linear layout)
      bias:         [output_dim]
      tau_m:        [output_dim]
      mem0:         [B, output_dim]  initial membrane state
    Returns:
      mems: [T, B, output_dim]  membrane state after each step (mems[-1] final).
    """
    T, B, d_in = input_spikes.shape
    d_out = weight.shape[0]

    # Wrapper-side layout prep (fused by XLA outside the kernel):
    x_flat = input_spikes.astype(jnp.float32).reshape(T * B, d_in)  # .float()
    w_t = weight.astype(jnp.float32).T                              # [d_in, d_out]
    bias_tau = jnp.stack(
        [bias.astype(jnp.float32), tau_m.astype(jnp.float32)], axis=0
    )                                                               # [2, d_out]
    mem0 = mem0.astype(jnp.float32)

    def kernel(x_ref, wt_ref, bt_ref, mem0_ref, out_ref):
        # One MXU matmul covering ALL timesteps: [T*B, d_in] @ [d_in, d_out].
        d_all = jnp.dot(
            x_ref[...], wt_ref[...], preferred_element_type=jnp.float32
        )
        d_all = d_all + bt_ref[0:1, :]              # bias add, hoisted (once)
        alpha = jax.nn.sigmoid(bt_ref[1:2, :])      # [1, d_out], computed once
        one_minus_alpha = 1.0 - alpha

        # Fully unrolled elementwise recurrence on the VPU (T static & small);
        # equivalent to lax.fori_loop(0, T, ..., unroll=True).
        mem = mem0_ref[...]                         # [B, d_out]
        for t in range(T):
            mem = mem * alpha + one_minus_alpha * d_all[t * B:(t + 1) * B, :]
            out_ref[t] = mem

    # Single grid step: whole problem is a few KB, so everything uses default
    # full-array VMEM blocks; exactly one HBM writeback of [T, B, d_out].
    return pl.pallas_call(
        kernel,
        out_shape=jax.ShapeDtypeStruct((T, B, d_out), jnp.float32),
    )(x_flat, w_t, bias_tau, mem0)


# ---------------------------------------------------------------------------
# Single-step kernel (matches the module's forward() exactly).  This path is
# launch-overhead bound at these sizes; repeated stepping should go through
# readout_integrator_sequence.  The membrane state is aliased to the output
# (in-place update) — callers must not reuse the passed-in `mem` afterwards.
# ---------------------------------------------------------------------------
def _readout_step_kernel(x_ref, wt_ref, bt_ref, mem_ref, out_ref):
    d_input = jnp.dot(
        x_ref[...], wt_ref[...], preferred_element_type=jnp.float32
    ) + bt_ref[0:1, :]
    alpha = jax.nn.sigmoid(bt_ref[1:2, :])
    out_ref[...] = mem_ref[...] * alpha + (1.0 - alpha) * d_input


def readout_integrator_step(input_spike, weight, bias, tau_m, mem):
    """One forward() call: returns the new membrane state [B, output_dim]."""
    B, _ = input_spike.shape
    d_out = weight.shape[0]

    x = input_spike.astype(jnp.float32)
    w_t = weight.astype(jnp.float32).T                              # [d_in, d_out]
    bias_tau = jnp.stack(
        [bias.astype(jnp.float32), tau_m.astype(jnp.float32)], axis=0
    )
    mem = mem.astype(jnp.float32)

    return pl.pallas_call(
        _readout_step_kernel,
        out_shape=jax.ShapeDtypeStruct((B, d_out), jnp.float32),
        input_output_aliases={3: 0},                # mem updated in place
    )(x, w_t, bias_tau, mem)


# ---------------------------------------------------------------------------
# Pure-JAX references
# ---------------------------------------------------------------------------
def _reference_step(input_spike, weight, bias, tau_m, mem):
    d_input = input_spike.astype(jnp.float32) @ weight.T + bias
    alpha = jax.nn.sigmoid(tau_m)
    return mem * alpha + (1.0 - alpha) * d_input


def _reference_sequence(input_spikes, weight, bias, tau_m, mem0):
    mem = mem0
    outs = []
    for t in range(input_spikes.shape[0]):
        mem = _reference_step(input_spikes[t], weight, bias, tau_m, mem)
        outs.append(mem)
    return jnp.stack(outs, axis=0)


if __name__ == "__main__":
    # Small shapes consistent with the module: T=8 timesteps, batch=2,
    # input_dim=32, output_dim=16.
    T, B, input_dim, output_dim = 8, 2, 32, 16
    key = jax.random.PRNGKey(0)
    k_x, k_w, k_b, k_tau, k_mem = jax.random.split(key, 5)

    # Deterministic parameter init mirroring the module's __init__:
    #   nn.Linear default: U(-1/sqrt(fan_in), 1/sqrt(fan_in)) for weight & bias
    #   tau_m: uniform in [low_m, high_m] = [0, 4]
    bound = 1.0 / (float(input_dim) ** 0.5)
    weight = jax.random.uniform(k_w, (output_dim, input_dim),
                                minval=-bound, maxval=bound, dtype=jnp.float32)
    bias = jax.random.uniform(k_b, (output_dim,),
                              minval=-bound, maxval=bound, dtype=jnp.float32)
    tau_m = jax.random.uniform(k_tau, (output_dim,),
                               minval=0.0, maxval=4.0, dtype=jnp.float32)

    # set_neuron_state: mem = rand(batch, output_dim)
    mem0 = jax.random.uniform(k_mem, (B, output_dim), dtype=jnp.float32)

    # Binary-ish spike inputs for T timesteps (forward casts to float anyway).
    input_spikes = (jax.random.uniform(k_x, (T, B, input_dim)) > 0.5).astype(
        jnp.float32)

    # References computed up-front (the single-step kernel donates `mem0`).
    ref_seq = _reference_sequence(input_spikes, weight, bias, tau_m, mem0)
    ref1 = _reference_step(input_spikes[0], weight, bias, tau_m, mem0)

    # --- fused multi-timestep kernel --------------------------------------
    mems_seq = readout_integrator_sequence(input_spikes, weight, bias, tau_m,
                                           mem0)
    mems_seq = jax.block_until_ready(mems_seq)
    assert mems_seq.shape == (T, B, output_dim)
    assert jnp.allclose(mems_seq, ref_seq, atol=1e-5, rtol=1e-5), \
        "sequence kernel mismatch vs reference"

    # --- single-step kernel (module forward), run last (it donates mem0) ---
    mem1 = readout_integrator_step(input_spikes[0], weight, bias, tau_m, mem0)
    mem1 = jax.block_until_ready(mem1)
    assert mem1.shape == (B, output_dim)
    assert jnp.allclose(mem1, ref1, atol=1e-5, rtol=1e-5), \
        "single-step kernel mismatch vs reference"

    print("KERNEL_OK")
</pallas_src>

<mosaic_0001>
module attributes {stable_mosaic.version = 11 : i64} {
  func.func @kernel(%arg0: memref<16x32xf32, #tpu.memory_space<vmem>>, %arg1: memref<32x16xf32, #tpu.memory_space<vmem>>, %arg2: memref<2x16xf32, #tpu.memory_space<vmem>>, %arg3: memref<2x16xf32, #tpu.memory_space<vmem>>, %arg4: memref<8x2x16xf32, #tpu.memory_space<vmem>>) attributes {dimension_semantics = [], scalar_prefetch = 0 : i64, scratch_operands = 0 : i64, tpu.core_type = #tpu.core_type<tc>} {
    %c0 = arith.constant 0 : index
    %c0_0 = arith.constant 0 : index
    %0 = vector.load %arg0[%c0, %c0_0] : memref<16x32xf32, #tpu.memory_space<vmem>>, vector<16x32xf32>
    %c0_1 = arith.constant 0 : index
    %c0_2 = arith.constant 0 : index
    %1 = vector.load %arg1[%c0_1, %c0_2] : memref<32x16xf32, #tpu.memory_space<vmem>>, vector<32x16xf32>
    %cst = arith.constant dense<0.000000e+00> : vector<16x16xf32>
    %2 = tpu.matmul %0, %1, %cst {dimension_numbers = #tpu.dot_dimension_numbers<[1], [0], [0], [1], [0, 0, 1, 1], [], []>} : vector<16x32xf32>, vector<32x16xf32>, vector<16x16xf32> -> vector<16x16xf32>
    %c0_3 = arith.constant 0 : index
    %c0_4 = arith.constant 0 : index
    %3 = vector.load %arg2[%c0_3, %c0_4] : memref<2x16xf32, #tpu.memory_space<vmem>>, vector<1x16xf32>
    %4 = vector.broadcast %3 : vector<1x16xf32> to vector<16x16xf32>
    %5 = arith.addf %2, %4 : vector<16x16xf32>
    %c1 = arith.constant 1 : index
    %c0_5 = arith.constant 0 : index
    %6 = vector.load %arg2[%c1, %c0_5] : memref<2x16xf32, #tpu.memory_space<vmem>>, vector<1x16xf32>
    %7 = arith.negf %6 : vector<1x16xf32>
    %8 = math.exp %7 : vector<1x16xf32>
    %cst_6 = arith.constant 1.000000e+00 : f32
    %9 = vector.broadcast %cst_6 : f32 to vector<1x16xf32>
    %10 = arith.addf %9, %8 : vector<1x16xf32>
    %11 = arith.divf %9, %10 : vector<1x16xf32>
    %cst_7 = arith.constant 1.000000e+00 : f32
    %12 = vector.broadcast %cst_7 : f32 to vector<1x16xf32>
    %13 = arith.subf %12, %11 : vector<1x16xf32>
    %c0_8 = arith.constant 0 : index
    %c0_9 = arith.constant 0 : index
    %14 = vector.load %arg3[%c0_8, %c0_9] : memref<2x16xf32, #tpu.memory_space<vmem>>, vector<2x16xf32>
    %15 = vector.broadcast %11 : vector<1x16xf32> to vector<2x16xf32>
    %16 = arith.mulf %14, %15 : vector<2x16xf32>
    %17 = vector.extract_strided_slice %5 {offsets = [0, 0], sizes = [2, 16], strides = [1, 1]} : vector<16x16xf32> to vector<2x16xf32>
    %18 = vector.broadcast %13 : vector<1x16xf32> to vector<2x16xf32>
    %19 = arith.mulf %18, %17 : vector<2x16xf32>
    %20 = arith.addf %16, %19 : vector<2x16xf32>
    %c0_10 = arith.constant 0 : index
    %c0_11 = arith.constant 0 : index
    %c0_12 = arith.constant 0 : index
    %21 = vector.load %arg4[%c0_10, %c0_11, %c0_12] : memref<8x2x16xf32, #tpu.memory_space<vmem>>, vector<1x2x16xf32>
    %22 = vector.shape_cast %21 : vector<1x2x16xf32> to vector<2x16xf32>
    %23 = vector.shape_cast %20 : vector<2x16xf32> to vector<1x2x16xf32>
    tpu.vector_store %arg4[%c0_10, %c0_11, %c0_12], %23 {strides = array<i32>} : memref<8x2x16xf32, #tpu.memory_space<vmem>>, vector<1x2x16xf32>,
    %24 = vector.broadcast %11 : vector<1x16xf32> to vector<2x16xf32>
    %25 = arith.mulf %20, %24 : vector<2x16xf32>
    %26 = vector.extract_strided_slice %5 {offsets = [2, 0], sizes = [2, 16], strides = [1, 1]} : vector<16x16xf32> to vector<2x16xf32>
    %27 = vector.broadcast %13 : vector<1x16xf32> to vector<2x16xf32>
    %28 = arith.mulf %27, %26 : vector<2x16xf32>
    %29 = arith.addf %25, %28 : vector<2x16xf32>
    %c1_13 = arith.constant 1 : index
    %c0_14 = arith.constant 0 : index
    %c0_15 = arith.constant 0 : index
    %30 = vector.load %arg4[%c1_13, %c0_14, %c0_15] : memref<8x2x16xf32, #tpu.memory_space<vmem>>, vector<1x2x16xf32>
    %31 = vector.shape_cast %30 : vector<1x2x16xf32> to vector<2x16xf32>
    %32 = vector.shape_cast %29 : vector<2x16xf32> to vector<1x2x16xf32>
    tpu.vector_store %arg4[%c1_13, %c0_14, %c0_15], %32 {strides = array<i32>} : memref<8x2x16xf32, #tpu.memory_space<vmem>>, vector<1x2x16xf32>,
    %33 = vector.broadcast %11 : vector<1x16xf32> to vector<2x16xf32>
    %34 = arith.mulf %29, %33 : vector<2x16xf32>
    %35 = vector.extract_strided_slice %5 {offsets = [4, 0], sizes = [2, 16], strides = [1, 1]} : vector<16x16xf32> to vector<2x16xf32>
    %36 = vector.broadcast %13 : vector<1x16xf32> to vector<2x16xf32>
    %37 = arith.mulf %36, %35 : vector<2x16xf32>
    %38 = arith.addf %34, %37 : vector<2x16xf32>
    %c2 = arith.constant 2 : index
    %c0_16 = arith.constant 0 : index
    %c0_17 = arith.constant 0 : index
    %39 = vector.load %arg4[%c2, %c0_16, %c0_17] : memref<8x2x16xf32, #tpu.memory_space<vmem>>, vector<1x2x16xf32>
    %40 = vector.shape_cast %39 : vector<1x2x16xf32> to vector<2x16xf32>
    %41 = vector.shape_cast %38 : vector<2x16xf32> to vector<1x2x16xf32>
    tpu.vector_store %arg4[%c2, %c0_16, %c0_17], %41 {strides = array<i32>} : memref<8x2x16xf32, #tpu.memory_space<vmem>>, vector<1x2x16xf32>,
    %42 = vector.broadcast %11 : vector<1x16xf32> to vector<2x16xf32>
    %43 = arith.mulf %38, %42 : vector<2x16xf32>
    %44 = vector.extract_strided_slice %5 {offsets = [6, 0], sizes = [2, 16], strides = [1, 1]} : vector<16x16xf32> to vector<2x16xf32>
    %45 = vector.broadcast %13 : vector<1x16xf32> to vector<2x16xf32>
    %46 = arith.mulf %45, %44 : vector<2x16xf32>
    %47 = arith.addf %43, %46 : vector<2x16xf32>
    %c3 = arith.constant 3 : index
    %c0_18 = arith.constant 0 : index
    %c0_19 = arith.constant 0 : index
    %48 = vector.load %arg4[%c3, %c0_18, %c0_19] : memref<8x2x16xf32, #tpu.memory_space<vmem>>, vector<1x2x16xf32>
    %49 = vector.shape_cast %48 : vector<1x2x16xf32> to vector<2x16xf32>
    %50 = vector.shape_cast %47 : vector<2x16xf32> to vector<1x2x16xf32>
    tpu.vector_store %arg4[%c3, %c0_18, %c0_19], %50 {strides = array<i32>} : memref<8x2x16xf32, #tpu.memory_space<vmem>>, vector<1x2x16xf32>,
    %51 = vector.broadcast %11 : vector<1x16xf32> to vector<2x16xf32>
    %52 = arith.mulf %47, %51 : vector<2x16xf32>
    %53 = vector.extract_strided_slice %5 {offsets = [8, 0], sizes = [2, 16], strides = [1, 1]} : vector<16x16xf32> to vector<2x16xf32>
    %54 = vector.broadcast %13 : vector<1x16xf32> to vector<2x16xf32>
    %55 = arith.mulf %54, %53 : vector<2x16xf32>
    %56 = arith.addf %52, %55 : vector<2x16xf32>
    %c4 = arith.constant 4 : index
    %c0_20 = arith.constant 0 : index
    %c0_21 = arith.constant 0 : index
    %57 = vector.load %arg4[%c4, %c0_20, %c0_21] : memref<8x2x16xf32, #tpu.memory_space<vmem>>, vector<1x2x16xf32>
    %58 = vector.shape_cast %57 : vector<1x2x16xf32> to vector<2x16xf32>
    %59 = vector.shape_cast %56 : vector<2x16xf32> to vector<1x2x16xf32>
    tpu.vector_store %arg4[%c4, %c0_20, %c0_21], %59 {strides = array<i32>} : memref<8x2x16xf32, #tpu.memory_space<vmem>>, vector<1x2x16xf32>,
    %60 = vector.broadcast %11 : vector<1x16xf32> to vector<2x16xf32>
    %61 = arith.mulf %56, %60 : vector<2x16xf32>
    %62 = vector.extract_strided_slice %5 {offsets = [10, 0], sizes = [2, 16], strides = [1, 1]} : vector<16x16xf32> to vector<2x16xf32>
    %63 = vector.broadcast %13 : vector<1x16xf32> to vector<2x16xf32>
    %64 = arith.mulf %63, %62 : vector<2x16xf32>
    %65 = arith.addf %61, %64 : vector<2x16xf32>
    %c5 = arith.constant 5 : index
    %c0_22 = arith.constant 0 : index
    %c0_23 = arith.constant 0 : index
    %66 = vector.load %arg4[%c5, %c0_22, %c0_23] : memref<8x2x16xf32, #tpu.memory_space<vmem>>, vector<1x2x16xf32>
    %67 = vector.shape_cast %66 : vector<1x2x16xf32> to vector<2x16xf32>
    %68 = vector.shape_cast %65 : vector<2x16xf32> to vector<1x2x16xf32>
    tpu.vector_store %arg4[%c5, %c0_22, %c0_23], %68 {strides = array<i32>} : memref<8x2x16xf32, #tpu.memory_space<vmem>>, vector<1x2x16xf32>,
    %69 = vector.broadcast %11 : vector<1x16xf32> to vector<2x16xf32>
    %70 = arith.mulf %65, %69 : vector<2x16xf32>
    %71 = vector.extract_strided_slice %5 {offsets = [12, 0], sizes = [2, 16], strides = [1, 1]} : vector<16x16xf32> to vector<2x16xf32>
    %72 = vector.broadcast %13 : vector<1x16xf32> to vector<2x16xf32>
    %73 = arith.mulf %72, %71 : vector<2x16xf32>
    %74 = arith.addf %70, %73 : vector<2x16xf32>
    %c6 = arith.constant 6 : index
    %c0_24 = arith.constant 0 : index
    %c0_25 = arith.constant 0 : index
    %75 = vector.load %arg4[%c6, %c0_24, %c0_25] : memref<8x2x16xf32, #tpu.memory_space<vmem>>, vector<1x2x16xf32>
    %76 = vector.shape_cast %75 : vector<1x2x16xf32> to vector<2x16xf32>
    %77 = vector.shape_cast %74 : vector<2x16xf32> to vector<1x2x16xf32>
    tpu.vector_store %arg4[%c6, %c0_24, %c0_25], %77 {strides = array<i32>} : memref<8x2x16xf32, #tpu.memory_space<vmem>>, vector<1x2x16xf32>,
    %78 = vector.broadcast %11 : vector<1x16xf32> to vector<2x16xf32>
    %79 = arith.mulf %74, %78 : vector<2x16xf32>
    %80 = vector.extract_strided_slice %5 {offsets = [14, 0], sizes = [2, 16], strides = [1, 1]} : vector<16x16xf32> to vector<2x16xf32>
    %81 = vector.broadcast %13 : vector<1x16xf32> to vector<2x16xf32>
    %82 = arith.mulf %81, %80 : vector<2x16xf32>
    %83 = arith.addf %79, %82 : vector<2x16xf32>
    %c7 = arith.constant 7 : index
    %c0_26 = arith.constant 0 : index
    %c0_27 = arith.constant 0 : index
    %84 = vector.load %arg4[%c7, %c0_26, %c0_27] : memref<8x2x16xf32, #tpu.memory_space<vmem>>, vector<1x2x16xf32>
    %85 = vector.shape_cast %84 : vector<1x2x16xf32> to vector<2x16xf32>
    %86 = vector.shape_cast %83 : vector<2x16xf32> to vector<1x2x16xf32>
    tpu.vector_store %arg4[%c7, %c0_26, %c0_27], %86 {strides = array<i32>} : memref<8x2x16xf32, #tpu.memory_space<vmem>>, vector<1x2x16xf32>,
    return
  }
}

</mosaic_0001>

<bundles_post_ra>
// kernel: tpu_custom_call.1
= control target key start
LH: loop header
LB: loop body
LE: loop exit
PB: predicated region body
PF: predicated region fallthrough
CT: control target
= control target key end

     0   :  { %vm29_vm0 = vcmask 261120   ;;  %s308_s0 = inlined_call_operand.vmem [shape: f32[16,32], index: 0, kind: input, shape index: {}]   ;;  %s309_s1 = inlined_call_operand.vmem [shape: f32[32,16], index: 1, kind: input, shape index: {}]   ;;  %s310_s2 = inlined_call_operand.vmem [shape: f32[2,16], index: 2, kind: input, shape index: {}]   ;;  %s311_s3 = inlined_call_operand.vmem [shape: f32[2,16], index: 3, kind: input, shape index: {}]   ;;  %s312_s4 = inlined_call_operand.hbm [shape: f32[8,2,16], index: 4, kind: output, shape index: {}]  }
   0x1   :  { %v23_v0 = vld [vmem:[%s309_s1 + $0x18] sm:$0xff]  ;;  %v22_v1 = vld [vmem:[%s309_s1 + $0x10] sm:$0xff]  ;;  %v18_v2 = vld [vmem:[%s308_s0] sm:$0xff] }
   0x2   :  { %202 = vmatprep.subr.mxu0 %v23_v0  ;;  %v21_v3 = vld [vmem:[%s309_s1 + $0x8] sm:$0xff]  ;;  %210 = vmatprep.mubr.msk.f32.mxu0 %vm29_vm0, %v18_v2 }
   0x3   :  { %203 = vmatpush3.msra.mxu0 %v23_v0 }
   0x4   :  { %9 = vsyncpa [#allocation3], 0  ;;  %204 = vmatprep.subr.mxu0 %v22_v1  ;;  %v20_v4 = vld [vmem:[%s309_s1] sm:$0xff]  ;;  %v19_v5 = vld [vmem:[%s308_s0 + $0x8] sm:$0xff]  ;;  %v120_v10 = vlaneseq  ;;  %vm131_vm1 = vcmask 123904  }
   0x5   :  { %205 = vmatpush3.msra.mxu0 %v22_v1  ;;  %v111_v6 = vld [vmem:[%s310_s2 + $0x1] sm:$0x1]  ;;  %v192_v18 = vld [vmem:[%s310_s2] ss:$0 sm:$0xff]  ;;  %s242_s2 = smov [#allocation2]  }
   0x6   :  { %206 = vmatprep.subr.mxu0 %v21_v3  ;;  %v195_v7 = vmul.f32 -1.442695, %v111_v6  ;;  %v121_v11 = vshrl.u32 %v120_v10, 7  ;;  %v119_v17 = vld [vmem:[%s311_s3] sm:$0x3]  ;;  %s181_s3 = sshll.u32 %s242_s2, 4  ;;  %s182_s3 = int_to_ptr.vmem [resolvable:$true] %s181_s3 }
   0x7   :  { %207 = vmatpush3.msra.mxu0 %v21_v3  ;;  %s220_s5 = scalar_lea.vmem %s182_s3, 256  ;;  %p225_p1 = scmp.lt.s32.totalorder %s182_s3, %s182_s3 }
   0x8   :  { %208 = vmatprep.subr.mxu0 %v20_v4  ;;  %216 = vpow2.f32 %v195_v7  ;;  %v122_v13 = vsub.s32 0, %v121_v11  ;;  %p221_p0 = scmp.ne.s32.totalorder %s182_s3, %s220_s5  ;;  %p226_p2 = scmp.lt.s32.totalorder %s220_s5, %s220_s5 }
   0x9   :  { %209 = vmatpush3.msra.mxu0 %v20_v4 }
   0xa   :  { %211 = vmatmul.mubr.msk.f32.vlgmr.msra.gmra.mxu0 %vm29_vm0, %v19_v5  ;;  %p227_p3 = por %p226_p2, %p225_p1 }
   0xc   :  { %p228_p4 = pnand %p227_p3, %p221_p0 }
  0x15   :  { %v217_v8 = vpop.eup %216 }
  0x16   :  { %v115_v9 = vadd.f32 1.0, %v217_v8 }
  0x18   :  { %218 = vrcp.f32 %v115_v9 }
  0x25   :  { %v219_v12 = vpop.eup %218 }
  0x26   :  { %v118_v14 = vsub.f32 1.0, %v219_v12  ;;  %v123_v15 = vrot.slane %v219_v12, %v122_v13 }
  0x28   :  { %v128_v20 = vrot.slane %v118_v14, %v122_v13  ;;  %v124_v22 = vmul.f32 %v123_v15, %v119_v17 }
  0xca   :  { %v212_v16 = vpop.f32.mrf.mxu0 }
  0xcb   :  { %v108_v31 = vadd.f32 %v212_v16, %v192_v18 }
  0xcc   :  { %v102_v19 = vpop.f32.mrf.mxu0 }
  0xcd   :  { %v103_v21 = vadd.f32 %v192_v18, %v102_v19  ;;  %v153_v35 = vmul.f32 %v128_v20, %v108_v31 }
  0xcf   :  { %v129_v23 = vmul.f32 %v128_v20, %v103_v21  ;;  %v159_v38 = vrot.slane %v153_v35, 2  ;;  %v165_v41 = vrot.slane %v153_v35, 4  ;;  %v171_v44 = vrot.slane %v153_v35, 6 }
  0xd1   :  { %v130_v24 = vadd.f32 %v129_v23, %v124_v22  ;;  %v135_v26 = vrot.slane %v129_v23, 2  ;;  %v141_v29 = vrot.slane %v129_v23, 4  ;;  %v147_v33 = vrot.slane %v129_v23, 6 }
  0xd3   :  { %132 = vst.msk [vmem:[#allocation2] sm:$0x3] %vm131_vm1, %v130_v24  ;;  %v133_v25 = vmul.f32 %v130_v24, %v123_v15 }
  0xd5   :  { %v137_v27 = vadd.f32 %v135_v26, %v133_v25 }
  0xd7   :  { %139 = vst.msk [vmem:[#allocation2 + $0x2] sm:$0x3] %vm131_vm1, %v137_v27  ;;  %v140_v28 = vmul.f32 %v137_v27, %v123_v15 }
  0xd9   :  { %v143_v30 = vadd.f32 %v141_v29, %v140_v28 }
  0xdb   :  { %145 = vst.msk [vmem:[#allocation2 + $0x4] sm:$0x3] %vm131_vm1, %v143_v30  ;;  %v146_v32 = vmul.f32 %v143_v30, %v123_v15 }
  0xdd   :  { %v149_v34 = vadd.f32 %v147_v33, %v146_v32 }
  0xdf   :  { %151 = vst.msk [vmem:[#allocation2 + $0x6] sm:$0x3] %vm131_vm1, %v149_v34  ;;  %v152_v36 = vmul.f32 %v149_v34, %v123_v15 }
  0xe1   :  { %v154_v37 = vadd.f32 %v153_v35, %v152_v36 }
  0xe3   :  { %156 = vst.msk [vmem:[#allocation2 + $0x8] sm:$0x3] %vm131_vm1, %v154_v37  ;;  %v157_v39 = vmul.f32 %v154_v37, %v123_v15 }
  0xe5   :  { %v161_v40 = vadd.f32 %v159_v38, %v157_v39 }
  0xe7   :  { %163 = vst.msk [vmem:[#allocation2 + $0xa] sm:$0x3] %vm131_vm1, %v161_v40  ;;  %v164_v42 = vmul.f32 %v161_v40, %v123_v15 }
  0xe9   :  { %v167_v43 = vadd.f32 %v165_v41, %v164_v42 }
  0xeb   :  { %169 = vst.msk [vmem:[#allocation2 + $0xc] sm:$0x3] %vm131_vm1, %v167_v43  ;;  %v170_v45 = vmul.f32 %v167_v43, %v123_v15 }
  0xed   :  { %v173_v46 = vadd.f32 %v171_v44, %v170_v45 }
  0xef   :  { %175 = vst.msk [vmem:[#allocation2 + $0xe] sm:$0x3] %vm131_vm1, %v173_v46 }
  0xf0   :  { %231 = shalt.err (!%p228_p4)
}
  0xf1   :  { %s243_s6 = smov 32   ;;  %s244_s7 = smov 2  }
  0xf2   :  { %187 = dma.vmem_to_hbm [thread:$0]  %s182_s3, 256, %s312_s4, [#allocation3], %s243_s6, %s243_s6, %s244_s7  }
  0xf3   :  { %240 = dma.done.wait [#allocation3], 256  }
  0xf4   :  { %241 = vsyncadd [#allocation3], 4294967040 }
  0xf5   :  { %191 = vsyncpa [#allocation3], 1 }

</bundles_post_ra>
